<compile_context>
chip_gen: v6e
topology: v6e:2x2x1
jax: 0.10.0
libtpu: 0.0.40
codegen_flags: <defaults>
</compile_context>

<pallas_src>
import math

import jax
import jax.numpy as jnp
from jax.experimental import pallas as pl
from jax.experimental.pallas import tpu as pltpu


def _round_up(n, m):
    return ((n + m - 1) // m) * m


def _mlp_kernel(x_ref, w1_ref, b1_ref, w2_ref, b2_ref, w3_ref, b3_ref, o_ref):
    # x: (TB, 784) f32; w1: (784, 256) bf16; w2: (256, 64) bf16; w3: (64, 128) bf16
    # biases are f32 (1, N); all matmuls accumulate in f32 on the MXU.
    x = x_ref[...].astype(jnp.bfloat16)   # cast in-kernel (VPU), keeps HBM traffic at 1x f32

    h1 = jnp.dot(x, w1_ref[...], preferred_element_type=jnp.float32) + b1_ref[...]
    h1 = jnp.maximum(h1, 0.0)  # ReLU in f32 (native VPU path on all chips)

    h2 = jnp.dot(h1.astype(jnp.bfloat16), w2_ref[...],
                 preferred_element_type=jnp.float32) + b2_ref[...]
    h2 = jnp.maximum(h2, 0.0)  # ReLU

    h3 = jnp.dot(h2.astype(jnp.bfloat16), w3_ref[...],
                 preferred_element_type=jnp.float32) + b3_ref[...]
    o_ref[...] = h3.astype(o_ref.dtype)


def mlp_forward(x_nchw, params, *, tb=512):
    """x_nchw: (B, 1, 28, 28) float32. Returns logits (B, 10) float32."""
    w1, b1, w2, b2, w3, b3 = params
    B = x_nchw.shape[0]
    # Glue: flatten exactly like torch's x.view(B, -1) on contiguous NCHW.
    x = x_nchw.reshape(B, 28 * 28).astype(jnp.float32)

    # Batch tile: multiple of 8 sublanes, capped at `tb` (default 512).
    TB = min(tb, _round_up(max(B, 1), 8))
    B_pad = _round_up(B, TB)
    if B_pad != B:
        x = jnp.pad(x, ((0, B_pad - B), (0, 0)))

    K, H1, H2 = 28 * 28, w1.shape[1], w2.shape[1]   # 784, 256, 64
    NO = 128                                        # lane-dense padded logits dim

    # bf16 MXU weights; biases stay f32 as (1, N) 2-D VMEM tiles.
    w1_bf = w1.astype(jnp.bfloat16)
    w2_bf = w2.astype(jnp.bfloat16)
    w3_p = jnp.zeros((H2, NO), jnp.bfloat16).at[:, :10].set(w3.astype(jnp.bfloat16))
    b1_2d = b1.reshape(1, -1).astype(jnp.float32)
    b2_2d = b2.reshape(1, -1).astype(jnp.float32)
    b3_p = jnp.zeros((1, NO), jnp.float32).at[:, :10].set(b3.astype(jnp.float32))

    grid = (B_pad // TB,)

    flops = 2 * B_pad * (K * H1 + H1 * H2 + H2 * NO)
    bytes_accessed = (B_pad * K * 4                       # x (f32)
                      + (K * H1 + H1 * H2 + H2 * NO) * 2  # weights (bf16)
                      + (H1 + H2 + NO) * 4                # biases (f32)
                      + B_pad * NO * 4)                   # output (f32)

    out = pl.pallas_call(
        _mlp_kernel,
        out_shape=jax.ShapeDtypeStruct((B_pad, NO), jnp.float32),
        grid=grid,
        in_specs=[
            pl.BlockSpec((TB, K), lambda i: (i, 0)),      # x: tiled over batch
            pl.BlockSpec((K, H1), lambda i: (0, 0)),      # w1: resident across grid steps
            pl.BlockSpec((1, H1), lambda i: (0, 0)),      # b1
            pl.BlockSpec((H1, H2), lambda i: (0, 0)),     # w2
            pl.BlockSpec((1, H2), lambda i: (0, 0)),      # b2
            pl.BlockSpec((H2, NO), lambda i: (0, 0)),     # w3 (padded to 128 cols)
            pl.BlockSpec((1, NO), lambda i: (0, 0)),      # b3 (padded)
        ],
        out_specs=pl.BlockSpec((TB, NO), lambda i: (i, 0)),
        compiler_params=pltpu.CompilerParams(
            dimension_semantics=("parallel",)),
        cost_estimate=pl.CostEstimate(
            flops=flops, transcendentals=0, bytes_accessed=bytes_accessed),
    )(x, w1_bf, b1_2d, w2_bf, b2_2d, w3_p, b3_p)

    return out[:B, :10]


def init_params(key):
    """Deterministic init mimicking torch.nn.Linear default (uniform +/- 1/sqrt(fan_in))."""
    shapes = [(28 * 28, 256), (256, 64), (64, 10)]
    params = []
    for fan_in, fan_out in shapes:
        key, kw, kb = jax.random.split(key, 3)
        bound = 1.0 / math.sqrt(fan_in)
        w = jax.random.uniform(kw, (fan_in, fan_out), jnp.float32, -bound, bound)
        b = jax.random.uniform(kb, (fan_out,), jnp.float32, -bound, bound)
        params.extend([w, b])
    return tuple(params)


def reference_forward(x_nchw, params):
    w1, b1, w2, b2, w3, b3 = params
    x = x_nchw.reshape(x_nchw.shape[0], -1)
    h1 = jnp.maximum(x @ w1 + b1, 0.0)
    h2 = jnp.maximum(h1 @ w2 + b2, 0.0)
    return h2 @ w3 + b3


if __name__ == "__main__":
    key = jax.random.PRNGKey(0)
    k_params, k_x1, k_x2 = jax.random.split(key, 3)

    params = init_params(k_params)

    # Small MNIST-shaped batch (matches x.view(B, 1, 28, 28) in the spec).
    x_small = jax.random.normal(k_x1, (2, 1, 28, 28), jnp.float32)
    logits_small = mlp_forward(x_small, params)
    jax.block_until_ready(logits_small)
    ref_small = reference_forward(x_small, params)
    assert logits_small.shape == (2, 10)
    assert jnp.allclose(logits_small, ref_small, atol=2e-2, rtol=2e-2), \
        "mismatch vs reference (small batch)"

    # Larger batch with a small tile to exercise the batch grid (>1 step) and row padding.
    x_big = jax.random.normal(k_x2, (300, 1, 28, 28), jnp.float32)
    logits_big = mlp_forward(x_big, params, tb=128)   # grid of 3 tiles, padded to 384 rows
    jax.block_until_ready(logits_big)
    ref_big = reference_forward(x_big, params)
    assert logits_big.shape == (300, 10)
    assert jnp.allclose(logits_big, ref_big, atol=2e-2, rtol=2e-2), \
        "mismatch vs reference (tiled batch)"

    print("KERNEL_OK")
</pallas_src>

<mosaic_0001>
module attributes {stable_mosaic.version = 11 : i64} {
  func.func @_mlp_kernel(%arg0: i32, %arg1: memref<8x784xf32, #tpu.memory_space<vmem>>, %arg2: memref<784x256xbf16, #tpu.memory_space<vmem>>, %arg3: memref<1x256xf32, #tpu.memory_space<vmem>>, %arg4: memref<256x64xbf16, #tpu.memory_space<vmem>>, %arg5: memref<1x64xf32, #tpu.memory_space<vmem>>, %arg6: memref<64x128xbf16, #tpu.memory_space<vmem>>, %arg7: memref<1x128xf32, #tpu.memory_space<vmem>>, %arg8: memref<8x128xf32, #tpu.memory_space<vmem>>) attributes {dimension_semantics = [#tpu.dimension_semantics<parallel>], iteration_bounds = array<i64: 1>, scalar_prefetch = 0 : i64, scratch_operands = 0 : i64, tpu.core_type = #tpu.core_type<tc>, window_params = [{transform_indices = @transform_0, window_bounds = array<i64: 8, 784>}, {pipeline_mode = #tpu.pipeline_mode<synchronous>, transform_indices = @transform_1, window_bounds = array<i64: 784, 256>}, {pipeline_mode = #tpu.pipeline_mode<synchronous>, transform_indices = @transform_2, window_bounds = array<i64: 1, 256>}, {pipeline_mode = #tpu.pipeline_mode<synchronous>, transform_indices = @transform_3, window_bounds = array<i64: 256, 64>}, {pipeline_mode = #tpu.pipeline_mode<synchronous>, transform_indices = @transform_4, window_bounds = array<i64: 1, 64>}, {pipeline_mode = #tpu.pipeline_mode<synchronous>, transform_indices = @transform_5, window_bounds = array<i64: 64, 128>}, {pipeline_mode = #tpu.pipeline_mode<synchronous>, transform_indices = @transform_6, window_bounds = array<i64: 1, 128>}, {transform_indices = @transform_7, window_bounds = array<i64: 8, 128>}]} {
    %c0 = arith.constant 0 : index
    %c0_0 = arith.constant 0 : index
    %0 = vector.load %arg1[%c0, %c0_0] : memref<8x784xf32, #tpu.memory_space<vmem>>, vector<8x784xf32>
    %1 = arith.truncf %0 : vector<8x784xf32> to vector<8x784xbf16>
    %c0_1 = arith.constant 0 : index
    %c0_2 = arith.constant 0 : index
    %2 = vector.load %arg2[%c0_1, %c0_2] : memref<784x256xbf16, #tpu.memory_space<vmem>>, vector<784x256xbf16>
    %cst = arith.constant dense<0.000000e+00> : vector<8x256xf32>
    %3 = tpu.matmul %1, %2, %cst {dimension_numbers = #tpu.dot_dimension_numbers<[1], [0], [0], [1], [0, 0, 1, 1], [], []>} : vector<8x784xbf16>, vector<784x256xbf16>, vector<8x256xf32> -> vector<8x256xf32>
    %c0_3 = arith.constant 0 : index
    %c0_4 = arith.constant 0 : index
    %4 = vector.load %arg3[%c0_3, %c0_4] : memref<1x256xf32, #tpu.memory_space<vmem>>, vector<1x256xf32>
    %5 = vector.broadcast %4 : vector<1x256xf32> to vector<8x256xf32>
    %6 = arith.addf %3, %5 : vector<8x256xf32>
    %cst_5 = arith.constant 0.000000e+00 : f32
    %7 = vector.broadcast %cst_5 : f32 to vector<8x256xf32>
    %8 = arith.maximumf %6, %7 : vector<8x256xf32>
    %9 = arith.truncf %8 : vector<8x256xf32> to vector<8x256xbf16>
    %c0_6 = arith.constant 0 : index
    %c0_7 = arith.constant 0 : index
    %10 = vector.load %arg4[%c0_6, %c0_7] : memref<256x64xbf16, #tpu.memory_space<vmem>>, vector<256x64xbf16>
    %cst_8 = arith.constant dense<0.000000e+00> : vector<8x64xf32>
    %11 = tpu.matmul %9, %10, %cst_8 {dimension_numbers = #tpu.dot_dimension_numbers<[1], [0], [0], [1], [0, 0, 1, 1], [], []>} : vector<8x256xbf16>, vector<256x64xbf16>, vector<8x64xf32> -> vector<8x64xf32>
    %c0_9 = arith.constant 0 : index
    %c0_10 = arith.constant 0 : index
    %12 = vector.load %arg5[%c0_9, %c0_10] : memref<1x64xf32, #tpu.memory_space<vmem>>, vector<1x64xf32>
    %13 = vector.broadcast %12 : vector<1x64xf32> to vector<8x64xf32>
    %14 = arith.addf %11, %13 : vector<8x64xf32>
    %cst_11 = arith.constant 0.000000e+00 : f32
    %15 = vector.broadcast %cst_11 : f32 to vector<8x64xf32>
    %16 = arith.maximumf %14, %15 : vector<8x64xf32>
    %17 = arith.truncf %16 : vector<8x64xf32> to vector<8x64xbf16>
    %c0_12 = arith.constant 0 : index
    %c0_13 = arith.constant 0 : index
    %18 = vector.load %arg6[%c0_12, %c0_13] : memref<64x128xbf16, #tpu.memory_space<vmem>>, vector<64x128xbf16>
    %cst_14 = arith.constant dense<0.000000e+00> : vector<8x128xf32>
    %19 = tpu.matmul %17, %18, %cst_14 {dimension_numbers = #tpu.dot_dimension_numbers<[1], [0], [0], [1], [0, 0, 1, 1], [], []>} : vector<8x64xbf16>, vector<64x128xbf16>, vector<8x128xf32> -> vector<8x128xf32>
    %c0_15 = arith.constant 0 : index
    %c0_16 = arith.constant 0 : index
    %20 = vector.load %arg7[%c0_15, %c0_16] : memref<1x128xf32, #tpu.memory_space<vmem>>, vector<1x128xf32>
    %21 = vector.broadcast %20 : vector<1x128xf32> to vector<8x128xf32>
    %22 = arith.addf %19, %21 : vector<8x128xf32>
    %c0_17 = arith.constant 0 : index
    %c0_18 = arith.constant 0 : index
    %23 = vector.load %arg8[%c0_17, %c0_18] : memref<8x128xf32, #tpu.memory_space<vmem>>, vector<8x128xf32>
    tpu.vector_store %arg8[%c0_17, %c0_18], %22 {strides = array<i32>} : memref<8x128xf32, #tpu.memory_space<vmem>>, vector<8x128xf32>,
    return
  }
  func.func @transform_0(%arg0: i32) -> (i32, i32) {
    %c0_i32 = arith.constant 0 : i32
    %c0_i32_0 = arith.constant 0 : i32
    return %arg0, %c0_i32 : i32, i32
  }
  func.func @transform_1(%arg0: i32) -> (i32, i32) {
    %c0_i32 = arith.constant 0 : i32
    %c0_i32_0 = arith.constant 0 : i32
    %c0_i32_1 = arith.constant 0 : i32
    return %c0_i32, %c0_i32_0 : i32, i32
  }
  func.func @transform_2(%arg0: i32) -> (i32, i32) {
    %c0_i32 = arith.constant 0 : i32
    %c0_i32_0 = arith.constant 0 : i32
    %c0_i32_1 = arith.constant 0 : i32
    return %c0_i32, %c0_i32_0 : i32, i32
  }
  func.func @transform_3(%arg0: i32) -> (i32, i32) {
    %c0_i32 = arith.constant 0 : i32
    %c0_i32_0 = arith.constant 0 : i32
    %c0_i32_1 = arith.constant 0 : i32
    return %c0_i32, %c0_i32_0 : i32, i32
  }
  func.func @transform_4(%arg0: i32) -> (i32, i32) {
    %c0_i32 = arith.constant 0 : i32
    %c0_i32_0 = arith.constant 0 : i32
    %c0_i32_1 = arith.constant 0 : i32
    return %c0_i32, %c0_i32_0 : i32, i32
  }
  func.func @transform_5(%arg0: i32) -> (i32, i32) {
    %c0_i32 = arith.constant 0 : i32
    %c0_i32_0 = arith.constant 0 : i32
    %c0_i32_1 = arith.constant 0 : i32
    return %c0_i32, %c0_i32_0 : i32, i32
  }
  func.func @transform_6(%arg0: i32) -> (i32, i32) {
    %c0_i32 = arith.constant 0 : i32
    %c0_i32_0 = arith.constant 0 : i32
    %c0_i32_1 = arith.constant 0 : i32
    return %c0_i32, %c0_i32_0 : i32, i32
  }
  func.func @transform_7(%arg0: i32) -> (i32, i32) {
    %c0_i32 = arith.constant 0 : i32
    %c0_i32_0 = arith.constant 0 : i32
    return %arg0, %c0_i32 : i32, i32
  }
}

</mosaic_0001>

<bundles_post_ra>
// kernel: tpu_custom_call.1
= control target key start
LH: loop header
LB: loop body
LE: loop exit
PB: predicated region body
PF: predicated region fallthrough
CT: control target
= control target key end

     0   :  { %12 = vsyncpa [#allocation3], 0  ;;  %s1627_s0 = inlined_call_operand.vmem [shape: f32[8,784], index: 0, kind: input, shape index: {}]   ;;  %s1628_s1 = inlined_call_operand.hbm [shape: bf16[784,256], index: 1, kind: input, shape index: {}]   ;;  %s1629_s2 = inlined_call_operand.vmem [shape: f32[1,256], index: 2, kind: input, shape index: {}]   ;;  %s1630_s3 = inlined_call_operand.vmem [shape: bf16[256,64], index: 3, kind: input, shape index: {}]   ;;  %s1631_s4 = inlined_call_operand.vmem [shape: f32[1,64], index: 4, kind: input, shape index: {}]   ;;  %s1632_s5 = inlined_call_operand.vmem [shape: bf16[64,128], index: 5, kind: input, shape index: {}]   ;;  %s1633_s6 = inlined_call_operand.vmem [shape: f32[1,128], index: 6, kind: input, shape index: {}]   ;;  %s1634_s7 = inlined_call_operand.hbm [shape: f32[8,128], index: 7, kind: output, shape index: {}]  }
   0x1   :  { %13 = vsyncpa [#allocation4], 0  ;;  %s1483_s24 = smov [#allocation2]  }
   0x2   :  { %s21_s25 = sshll.u32 %s1483_s24, 4  ;;  %s22_s25 = int_to_ptr.vmem [resolvable:$true] %s21_s25 }
   0x3   :  { %s1447_s26 = scalar_lea.vmem %s22_s25, 12544  ;;  %p1452_p1 = scmp.lt.s32.totalorder %s22_s25, %s22_s25 }
   0x4   :  { %p1448_p0 = scmp.ne.s32.totalorder %s22_s25, %s1447_s26  ;;  %p1453_p2 = scmp.lt.s32.totalorder %s1447_s26, %s1447_s26 }
   0x6   :  { %p1454_p3 = por %p1453_p2, %p1452_p1 }
   0x8   :  { %p1455_p4 = pnand %p1454_p3, %p1448_p0 }
   0xa   :  { %1458 = shalt.err (!%p1455_p4)
}
   0xb   :  { %s1484_s27 = smov 128   ;;  %s1485_s28 = smov 8  }
   0xc   :  { %27 = dma.hbm_to_vmem [thread:$0]  %s1628_s1, 12544, %s22_s25, [#allocation3], %s1484_s27, %s1484_s27, %s1485_s28  }
   0xd   :  { %1479 = dma.done.wait [#allocation3], 12544  }
   0xe   :  { %1480 = vsyncadd [#allocation3], 4294954752  ;;  %v1272_v0 = vld [vmem:[#allocation2 + $0x74] ss:$8 sps:$4 sm:$0xff]   ;;  %v1274_v1 = vld [vmem:[#allocation2 + $0x70] ss:$8 sps:$4 sm:$0xff]  }
   0xf   :  { %660 = vmatprep.subr.bf16.mxu0 %v1272_v0  ;;  %v1275_v2 = vld [vmem:[#allocation2 + $0x174] ss:$8 sps:$4 sm:$0xff]   ;;  %v1277_v3 = vld [vmem:[#allocation2 + $0x170] ss:$8 sps:$4 sm:$0xff]   ;;  %v1278_v4 = vld [vmem:[#allocation2 + $0x64] ss:$8 sps:$4 sm:$0xff]  }
  0x10   :  { %661 = vmatpush1.bf16.msra.mxu0 %v1274_v1  ;;  %v1280_v5 = vld [vmem:[#allocation2 + $0x60] ss:$8 sps:$4 sm:$0xff]   ;;  %701 = vmatprep.subr.bf16.mxu1 %v1275_v2  ;;  %v1281_v6 = vld [vmem:[#allocation2 + $0x164] ss:$8 sps:$4 sm:$0xff]   ;;  %v1284_v8 = vld [vmem:[#allocation2 + $0x54] ss:$8 sps:$4 sm:$0xff]  }
  0x11   :  { %702 = vmatpush1.bf16.msra.mxu1 %v1277_v3  ;;  %662 = vmatprep.subr.bf16.mxu0 %v1278_v4  ;;  %v1283_v7 = vld [vmem:[#allocation2 + $0x160] ss:$8 sps:$4 sm:$0xff]   ;;  %v1286_v9 = vld [vmem:[#allocation2 + $0x50] ss:$8 sps:$4 sm:$0xff]   ;;  %v1287_v10 = vld [vmem:[#allocation2 + $0x154] ss:$8 sps:$4 sm:$0xff]  }
  0x12   :  { %703 = vmatprep.subr.bf16.mxu1 %v1281_v6  ;;  %v1290_v11 = vld [vmem:[#allocation2 + $0x44] ss:$8 sps:$4 sm:$0xff]   ;;  %v1289_v12 = vld [vmem:[#allocation2 + $0x150] ss:$8 sps:$4 sm:$0xff]   ;;  %v1292_v14 = vld [vmem:[#allocation2 + $0x40] ss:$8 sps:$4 sm:$0xff]  }
  0x13   :  { %v1293_v13 = vld [vmem:[#allocation2 + $0x144] ss:$8 sps:$4 sm:$0xff]   ;;  %v1296_v15 = vld [vmem:[#allocation2 + $0x34] ss:$8 sps:$4 sm:$0xff]   ;;  %v1295_v16 = vld [vmem:[#allocation2 + $0x140] ss:$8 sps:$4 sm:$0xff]  }
  0x14   :  { %663 = vmatpush1.bf16.msra.mxu0 %v1280_v5  ;;  %v1299_v17 = vld [vmem:[#allocation2 + $0x134] ss:$8 sps:$4 sm:$0xff]   ;;  %v1298_v18 = vld [vmem:[#allocation2 + $0x30] ss:$8 sps:$4 sm:$0xff]   ;;  %v1302_v19 = vld [vmem:[#allocation2 + $0x24] ss:$8 sps:$4 sm:$0xff]  }
  0x15   :  { %664 = vmatprep.subr.bf16.mxu0 %v1284_v8  ;;  %704 = vmatpush1.bf16.msra.mxu1 %v1283_v7  ;;  %v1301_v20 = vld [vmem:[#allocation2 + $0x130] ss:$8 sps:$4 sm:$0xff]   ;;  %v1305_v21 = vld [vmem:[#allocation2 + $0x124] ss:$8 sps:$4 sm:$0xff]   ;;  %v1304_v22 = vld [vmem:[#allocation2 + $0x20] ss:$8 sps:$4 sm:$0xff]  }
  0x16   :  { %705 = vmatprep.subr.bf16.mxu1 %v1287_v10  ;;  %v1308_v23 = vld [vmem:[#allocation2 + $0x14] ss:$8 sps:$4 sm:$0xff]   ;;  %v1307_v24 = vld [vmem:[#allocation2 + $0x120] ss:$8 sps:$4 sm:$0xff]   ;;  %v1310_v26 = vld [vmem:[#allocation2 + $0x10] ss:$8 sps:$4 sm:$0xff]  }
  0x17   :  { %v1311_v25 = vld [vmem:[#allocation2 + $0x114] ss:$8 sps:$4 sm:$0xff]   ;;  %v1314_v27 = vld [vmem:[#allocation2 + $0x4] ss:$8 sps:$4 sm:$0xff]   ;;  %v1313_v28 = vld [vmem:[#allocation2 + $0x110] ss:$8 sps:$4 sm:$0xff]  }
  0x18   :  { %665 = vmatpush1.bf16.msra.mxu0 %v1286_v9  ;;  %v1317_v29 = vld [vmem:[#allocation2 + $0x104] ss:$8 sps:$4 sm:$0xff]   ;;  %v1316_v30 = vld [vmem:[#allocation2] ss:$8 sps:$4 sm:$0xff]   ;;  %v1320_v31 = vld [vmem:[#allocation2 + $0xf4] ss:$8 sps:$4 sm:$0xff]  }
  0x19   :  { %666 = vmatprep.subr.bf16.mxu0 %v1290_v11  ;;  %706 = vmatpush1.bf16.msra.mxu1 %v1289_v12  ;;  %v1319_v32 = vld [vmem:[#allocation2 + $0x100] ss:$8 sps:$4 sm:$0xff]   ;;  %v1323_v33 = vld [vmem:[#allocation2 + $0x1f4] ss:$8 sps:$4 sm:$0xff]   ;;  %v1322_v34 = vld [vmem:[#allocation2 + $0xf0] ss:$8 sps:$4 sm:$0xff]  }
  0x1a   :  { %707 = vmatprep.subr.bf16.mxu1 %v1293_v13  ;;  %v1326_v35 = vld [vmem:[#allocation2 + $0xe4] ss:$8 sps:$4 sm:$0xff]   ;;  %v1325_v36 = vld [vmem:[#allocation2 + $0x1f0] ss:$8 sps:$4 sm:$0xff]   ;;  %v1328_v38 = vld [vmem:[#allocation2 + $0xe0] ss:$8 sps:$4 sm:$0xff]  }
  0x1b   :  { %v1329_v37 = vld [vmem:[#allocation2 + $0x1e4] ss:$8 sps:$4 sm:$0xff]   ;;  %v1332_v39 = vld [vmem:[#allocation2 + $0xd4] ss:$8 sps:$4 sm:$0xff]   ;;  %v1331_v40 = vld [vmem:[#allocation2 + $0x1e0] ss:$8 sps:$4 sm:$0xff]  }
  0x1c   :  { %667 = vmatpush1.bf16.msra.mxu0 %v1292_v14  ;;  %v1335_v41 = vld [vmem:[#allocation2 + $0x1d4] ss:$8 sps:$4 sm:$0xff]   ;;  %v1334_v42 = vld [vmem:[#allocation2 + $0xd0] ss:$8 sps:$4 sm:$0xff]   ;;  %v1338_v43 = vld [vmem:[#allocation2 + $0xc4] ss:$8 sps:$4 sm:$0xff]  }
  0x1d   :  { %668 = vmatprep.subr.bf16.mxu0 %v1296_v15  ;;  %708 = vmatpush1.bf16.msra.mxu1 %v1295_v16  ;;  %v1337_v44 = vld [vmem:[#allocation2 + $0x1d0] ss:$8 sps:$4 sm:$0xff]   ;;  %v1341_v45 = vld [vmem:[#allocation2 + $0x1c4] ss:$8 sps:$4 sm:$0xff]   ;;  %v1340_v47 = vld [vmem:[#allocation2 + $0xc0] ss:$8 sps:$4 sm:$0xff]  }
  0x1e   :  { %709 = vmatprep.subr.bf16.mxu1 %v1299_v17  ;;  %v43_v46 = vld [vmem:[%s1627_s0 + $0x8] sm:$0xff]  ;;  %v1344_v49 = vld [vmem:[#allocation2 + $0xb4] ss:$8 sps:$4 sm:$0xff]   ;;  %v1346_v54 = vld [vmem:[#allocation2 + $0xb0] ss:$8 sps:$4 sm:$0xff]   ;;  %vm656_vm0 = vcmask 130048  }
  0x1f   :  { %v50_v48 = vpack.c.bf16 %v43_v46, %v43_v46  ;;  %v45_v50 = vld [vmem:[%s1627_s0 + $0x18] sm:$0xff]  ;;  %v1343_v51 = vld [vmem:[#allocation2 + $0x1c0] ss:$8 sps:$4 sm:$0xff]   ;;  %v1350_v55 = vld [vmem:[#allocation2 + $0xa4] ss:$8 sps:$4 sm:$0xff]   ;;  %vm1488_vm1 = vmmov 0  }
  0x20   :  { %669 = vmatpush1.bf16.msra.mxu0 %v1298_v18  ;;  %v52_v52 = vpack.c.bf16 %v45_v50, %v45_v50  ;;  %v1347_v53 = vld [vmem:[#allocation2 + $0x1b4] ss:$8 sps:$4 sm:$0xff]   ;;  %v1349_v56 = vld [vmem:[#allocation2 + $0x1b0] ss:$8 sps:$4 sm:$0xff]   ;;  %v1353_v57 = vld [vmem:[#allocation2 + $0x1a4] ss:$8 sps:$4 sm:$0xff]  }
  0x21   :  { %670 = vmatprep.subr.bf16.mxu0 %v1302_v19  ;;  %710 = vmatpush1.bf16.msra.mxu1 %v1301_v20  ;;  %v1352_v58 = vld [vmem:[#allocation2 + $0xa0] ss:$8 sps:$4 sm:$0xff]   ;;  %v1356_v59 = vld [vmem:[#allocation2 + $0x94] ss:$8 sps:$4 sm:$0xff]   ;;  %v1358_v62 = vld [vmem:[#allocation2 + $0x90] ss:$8 sps:$4 sm:$0xff]  }
  0x22   :  { %711 = vmatprep.subr.bf16.mxu1 %v1305_v21  ;;  %692 = vmatprep.mubr.bf16.mxu0 %v50_v48  ;;  %v1355_v60 = vld [vmem:[#allocation2 + $0x1a0] ss:$8 sps:$4 sm:$0xff]   ;;  %v1359_v61 = vld [vmem:[#allocation2 + $0x194] ss:$8 sps:$4 sm:$0xff]   ;;  %v1362_v63 = vld [vmem:[#allocation2 + $0x84] ss:$8 sps:$4 sm:$0xff]  }
  0x23   :  { %733 = vmatprep.mubr.bf16.mxu1 %v52_v52  ;;  %v1361_v0 = vld [vmem:[#allocation2 + $0x190] ss:$8 sps:$4 sm:$0xff]   ;;  %v1364_v1 = vld [vmem:[#allocation2 + $0x80] ss:$8 sps:$4 sm:$0xff]   ;;  %v1365_v2 = vld [vmem:[#allocation2 + $0x184] ss:$8 sps:$4 sm:$0xff]  }
  0x24   :  { %671 = vmatpush1.bf16.msra.mxu0 %v1304_v22  ;;  %v1367_v3 = vld [vmem:[#allocation2 + $0x180] ss:$8 sps:$4 sm:$0xff]   ;;  %v1370_v5 = vld [vmem:[#allocation2 + $0x274] ss:$8 sps:$4 sm:$0xff]   ;;  %v1368_v8 = vld [vmem:[#allocation2 + $0x270] ss:$8 sps:$4 sm:$0xff]  }
  0x25   :  { %672 = vmatprep.subr.bf16.mxu0 %v1308_v23  ;;  %712 = vmatpush1.bf16.msra.mxu1 %v1307_v24  ;;  %v42_v4 = vld [vmem:[%s1627_s0] sm:$0xff]  ;;  %v44_v6 = vld [vmem:[%s1627_s0 + $0x10] sm:$0xff]  ;;  %v47_v16 = vld [vmem:[%s1627_s0 + $0x28] sm:$0xff]  ;;  %v1486_v19 = vmov 0   ;;  %vm1044_vm2 = vcmask 523264  }
  0x26   :  { %713 = vmatprep.subr.bf16.mxu1 %v1311_v25  ;;  %v49_v7 = vpack.c.bf16 %v42_v4, %v42_v4  ;;  %v1373_v9 = vld [vmem:[#allocation2 + $0x264] ss:$8 sps:$4 sm:$0xff]   ;;  %v51_v10 = vpack.c.bf16 %v44_v6, %v44_v6  ;;  %v1413_v11 = vld [vmem:[#allocation2 + $0x300] ss:$8 sps:$4 sm:$0xff]   ;;  %v1376_v14 = vld [vmem:[#allocation2 + $0x254] ss:$8 sps:$4 sm:$0xff]   ;;  %v54_v17 = vpack.c.bf16 %v47_v16, %v47_v16 }
  0x27   :  { %v1415_v12 = vld [vmem:[#allocation2 + $0x304] ss:$8 sps:$4 sm:$0xff]   ;;  %v1371_v13 = vld [vmem:[#allocation2 + $0x260] ss:$8 sps:$4 sm:$0xff]   ;;  %v48_v15 = vld [vmem:[%s1627_s0 + $0x30] sm:$0xff] }
  0x28   :  { %673 = vmatpush1.bf16.msra.mxu0 %v1310_v26  ;;  %v1374_v18 = vld [vmem:[#allocation2 + $0x250] ss:$8 sps:$4 sm:$0xff]   ;;  %v1379_v20 = vld [vmem:[#allocation2 + $0x244] ss:$8 sps:$4 sm:$0xff]   ;;  %v55_v21 = vpack.c.bf16 %v48_v15, %v48_v15  ;;  %v1377_v22 = vld [vmem:[#allocation2 + $0x240] ss:$8 sps:$4 sm:$0xff]  }
  0x29   :  { %674 = vmatprep.subr.bf16.mxu0 %v1314_v27  ;;  %714 = vmatpush1.bf16.msra.mxu1 %v1313_v28  ;;  %v1382_v23 = vld [vmem:[#allocation2 + $0x234] ss:$8 sps:$4 sm:$0xff]   ;;  %v1380_v24 = vld [vmem:[#allocation2 + $0x230] ss:$8 sps:$4 sm:$0xff]   ;;  %v1385_v25 = vld [vmem:[#allocation2 + $0x224] ss:$8 sps:$4 sm:$0xff]  }
  0x2a   :  { %715 = vmatprep.subr.bf16.mxu1 %v1317_v29  ;;  %v1383_v26 = vld [vmem:[#allocation2 + $0x220] ss:$8 sps:$4 sm:$0xff]   ;;  %v1388_v27 = vld [vmem:[#allocation2 + $0x214] ss:$8 sps:$4 sm:$0xff]   ;;  %v1386_v28 = vld [vmem:[#allocation2 + $0x210] ss:$8 sps:$4 sm:$0xff]  }
  0x2b   :  { %v1391_v29 = vld [vmem:[#allocation2 + $0x204] ss:$8 sps:$4 sm:$0xff]   ;;  %v1416_v46 = vld [vmem:[#allocation2 + $0x280] ss:$8 sps:$4 sm:$0xff]   ;;  %v1420_v50 = vld [vmem:[%s1630_s3 + $0x38] sm:$0xff]  }
  0x2c   :  { %675 = vmatpush1.bf16.msra.mxu0 %v1316_v30  ;;  %v1389_v30 = vld [vmem:[#allocation2 + $0x200] ss:$8 sps:$4 sm:$0xff]   ;;  %v1422_v52 = vld [vmem:[%s1630_s3 + $0x30] sm:$0xff]  }
  0x2d   :  { %676 = vmatprep.subr.bf16.mxu0 %v1320_v31  ;;  %716 = vmatpush1.bf16.msra.mxu1 %v1319_v32  ;;  %v1394_v31 = vld [vmem:[#allocation2 + $0x2f4] ss:$8 sps:$4 sm:$0xff]   ;;  %v1392_v32 = vld [vmem:[#allocation2 + $0x2f0] ss:$8 sps:$4 sm:$0xff]  }
  0x2e   :  { %717 = vmatprep.subr.bf16.mxu1 %v1323_v33  ;;  %v1397_v33 = vld [vmem:[#allocation2 + $0x2e4] ss:$8 sps:$4 sm:$0xff]  }
  0x30   :  { %677 = vmatpush2.bf16.msra.mxu0 %v1322_v34  ;;  %v1395_v34 = vld [vmem:[#allocation2 + $0x2e0] ss:$8 sps:$4 sm:$0xff]  }
  0x31   :  { %678 = vmatprep.subr.bf16.mxu0 %v1326_v35  ;;  %718 = vmatpush2.bf16.msra.mxu1 %v1325_v36  ;;  %v1400_v35 = vld [vmem:[#allocation2 + $0x2d4] ss:$8 sps:$4 sm:$0xff]   ;;  %v1398_v36 = vld [vmem:[#allocation2 + $0x2d0] ss:$8 sps:$4 sm:$0xff]  }
  0x32   :  { %719 = vmatprep.subr.bf16.mxu1 %v1329_v37  ;;  %v1403_v37 = vld [vmem:[#allocation2 + $0x2c4] ss:$8 sps:$4 sm:$0xff]  }
  0x34   :  { %679 = vmatpush2.bf16.msra.mxu0 %v1328_v38  ;;  %v1401_v38 = vld [vmem:[#allocation2 + $0x2c0] ss:$8 sps:$4 sm:$0xff]  }
  0x35   :  { %680 = vmatprep.subr.bf16.mxu0 %v1332_v39  ;;  %720 = vmatpush2.bf16.msra.mxu1 %v1331_v40  ;;  %v1406_v39 = vld [vmem:[#allocation2 + $0x2b4] ss:$8 sps:$4 sm:$0xff]   ;;  %v1404_v40 = vld [vmem:[#allocation2 + $0x2b0] ss:$8 sps:$4 sm:$0xff]  }
  0x36   :  { %721 = vmatprep.subr.bf16.mxu1 %v1335_v41  ;;  %v1409_v41 = vld [vmem:[#allocation2 + $0x2a4] ss:$8 sps:$4 sm:$0xff]  }
  0x38   :  { %681 = vmatpush2.bf16.msra.mxu0 %v1334_v42  ;;  %v1407_v42 = vld [vmem:[#allocation2 + $0x2a0] ss:$8 sps:$4 sm:$0xff]  }
  0x39   :  { %682 = vmatprep.subr.bf16.mxu0 %v1338_v43  ;;  %722 = vmatpush2.bf16.msra.mxu1 %v1337_v44  ;;  %v1412_v43 = vld [vmem:[#allocation2 + $0x294] ss:$8 sps:$4 sm:$0xff]   ;;  %v1410_v44 = vld [vmem:[#allocation2 + $0x290] ss:$8 sps:$4 sm:$0xff]  }
  0x3a   :  { %723 = vmatprep.subr.bf16.mxu1 %v1341_v45  ;;  %v1418_v45 = vld [vmem:[#allocation2 + $0x284] ss:$8 sps:$4 sm:$0xff]  }
  0x3c   :  { %683 = vmatpush2.bf16.msra.mxu0 %v1340_v47  ;;  %v46_v47 = vld [vmem:[%s1627_s0 + $0x20] sm:$0xff] }
  0x3d   :  { %684 = vmatprep.subr.bf16.mxu0 %v1344_v49  ;;  %724 = vmatpush2.bf16.msra.mxu1 %v1343_v51  ;;  %v53_v48 = vpack.c.bf16 %v46_v47, %v46_v47  ;;  %v1419_v49 = vld [vmem:[%s1630_s3 + $0x78] sm:$0xff]   ;;  %v1421_v51 = vld [vmem:[%s1630_s3 + $0x70] sm:$0xff]  }
  0x3e   :  { %725 = vmatprep.subr.bf16.mxu1 %v1347_v53  ;;  %v1423_v53 = vld [vmem:[%s1630_s3 + $0x68] sm:$0xff]  }
  0x40   :  { %685 = vmatpush2.bf16.msra.mxu0 %v1346_v54  ;;  %v1424_v54 = vld [vmem:[%s1630_s3 + $0x28] sm:$0xff]  }
  0x41   :  { %686 = vmatprep.subr.bf16.mxu0 %v1350_v55  ;;  %726 = vmatpush2.bf16.msra.mxu1 %v1349_v56  ;;  %v1425_v55 = vld [vmem:[%s1630_s3 + $0x60] sm:$0xff]  }
  0x42   :  { %727 = vmatprep.subr.bf16.mxu1 %v1353_v57  ;;  %v1426_v56 = vld [vmem:[%s1630_s3 + $0x20] sm:$0xff]   ;;  %v1427_v57 = vld [vmem:[%s1630_s3 + $0x58] sm:$0xff]  }
  0x44   :  { %687 = vmatpush2.bf16.msra.mxu0 %v1352_v58  ;;  %v1428_v58 = vld [vmem:[%s1630_s3 + $0x18] sm:$0xff]  }
  0x45   :  { %688 = vmatprep.subr.bf16.mxu0 %v1356_v59  ;;  %728 = vmatpush2.bf16.msra.mxu1 %v1355_v60  ;;  %v1429_v59 = vld [vmem:[%s1630_s3 + $0x50] sm:$0xff]  }
  0x46   :  { %729 = vmatprep.subr.bf16.mxu1 %v1359_v61  ;;  %v1430_v60 = vld [vmem:[%s1630_s3 + $0x10] sm:$0xff]   ;;  %v1431_v61 = vld [vmem:[%s1630_s3 + $0x48] sm:$0xff]  }
  0x48   :  { %689 = vmatpush2.bf16.msra.mxu0 %v1358_v62  ;;  %v1432_v62 = vld [vmem:[%s1630_s3 + $0x8] sm:$0xff]  }
  0x49   :  { %690 = vmatprep.subr.bf16.mxu0 %v1362_v63  ;;  %730 = vmatpush2.bf16.msra.mxu1 %v1361_v0  ;;  %v1433_v63 = vld [vmem:[%s1630_s3 + $0x40] sm:$0xff]  }
  0x4a   :  { %731 = vmatprep.subr.bf16.mxu1 %v1365_v2  ;;  %v1434_v0 = vld [vmem:[%s1630_s3] sm:$0xff]  }
  0x4c   :  { %691 = vmatpush2.bf16.msra.mxu0 %v1364_v1  ;;  %v1487_v1 = vmov 0.0  }
  0x4d   :  { %742 = vmatprep.subr.bf16.mxu0 %v1370_v5  ;;  %732 = vmatpush2.bf16.msra.mxu1 %v1367_v3 }
  0x4e   :  { %797 = vmatprep.subr.bf16.mxu1 %v1415_v12 }
  0x4f   :  { %693 = vmatmul.mubr.bf16.vlgmr.msra.gmra.mxu0 %v49_v7 }
  0x50   :  { %743 = vmatpush1.bf16.msra.mxu0 %v1368_v8  ;;  %734 = vmatmul.mubr.bf16.vlgmr.msra.gmra.mxu1 %v51_v10 }
  0x51   :  { %744 = vmatprep.subr.bf16.mxu0 %v1373_v9  ;;  %798 = vmatpush1.bf16.msra.mxu1 %v1413_v11 }
  0x52   :  { %815 = vmatprep.mubr.bf16.mxu1 %v1486_v19  ;;  %774 = vmatprep.mubr.bf16.mxu0 %v54_v17  ;;  %v154_v17 = vld [vmem:[%s1629_s2] sm:$0x3] }
  0x53   :  { %1226 = vmatprep.subr.bf16.mxu1 %v1419_v49 }
  0x54   :  { %745 = vmatpush1.bf16.msra.mxu0 %v1371_v13 }
  0x55   :  { %746 = vmatprep.subr.bf16.mxu0 %v1376_v14  ;;  %v156_v14 = vlaneseq }
  0x57   :  { %v157_v15 = vshrl.u32 %v156_v14, 7 }
  0x58   :  { %747 = vmatpush1.bf16.msra.mxu0 %v1374_v18  ;;  %1202 = vmatmul.mubr.msk.bf16.vlgmr.msra.gmra.mxu1 %vm656_vm0, %v55_v21 }
  0x59   :  { %748 = vmatprep.subr.bf16.mxu0 %v1379_v20  ;;  %1227 = vmatpush3.bf16.msra.mxu1 %v1420_v50  ;;  %v158_v16 = vsub.s32 0, %v157_v15  ;;  %v162_v18 = vsub.s32 1, %v157_v15  ;;  %v1220_v50 = vld [vmem:[%s1633_s6] ss:$0 sm:$0xff] }
  0x5a   :  { %1228 = vmatprep.subr.bf16.mxu1 %v1421_v51 }
  0x5b   :  { %v159_v19 = vrot.slane %v154_v17, %v158_v16  ;;  %v163_v20 = vrot.slane %v154_v17, %v162_v18 }
  0x5c   :  { %749 = vmatpush1.bf16.msra.mxu0 %v1377_v22 }
  0x5d   :  { %750 = vmatprep.subr.bf16.mxu0 %v1382_v23  ;;  %1229 = vmatpush3.bf16.msra.mxu1 %v1422_v52 }
  0x5e   :  { %1230 = vmatprep.subr.bf16.mxu1 %v1423_v53 }
  0x60   :  { %751 = vmatpush1.bf16.msra.mxu0 %v1380_v24 }
  0x61   :  { %752 = vmatprep.subr.bf16.mxu0 %v1385_v25  ;;  %1231 = vmatpush3.bf16.msra.mxu1 %v1424_v54 }
  0x62   :  { %1232 = vmatprep.subr.bf16.mxu1 %v1425_v55 }
  0x64   :  { %753 = vmatpush1.bf16.msra.mxu0 %v1383_v26 }
  0x65   :  { %754 = vmatprep.subr.bf16.mxu0 %v1388_v27  ;;  %1233 = vmatpush3.bf16.msra.mxu1 %v1426_v56 }
  0x66   :  { %1234 = vmatprep.subr.bf16.mxu1 %v1427_v57 }
  0x68   :  { %755 = vmatpush1.bf16.msra.mxu0 %v1386_v28 }
  0x69   :  { %756 = vmatprep.subr.bf16.mxu0 %v1391_v29  ;;  %1235 = vmatpush3.bf16.msra.mxu1 %v1428_v58 }
  0x6a   :  { %1236 = vmatprep.subr.bf16.mxu1 %v1429_v59 }
  0x6c   :  { %757 = vmatpush1.bf16.msra.mxu0 %v1389_v30 }
  0x6d   :  { %758 = vmatprep.subr.bf16.mxu0 %v1394_v31  ;;  %1237 = vmatpush3.bf16.msra.mxu1 %v1430_v60 }
  0x6e   :  { %1238 = vmatprep.subr.bf16.mxu1 %v1431_v61 }
  0x70   :  { %759 = vmatpush2.bf16.msra.mxu0 %v1392_v32 }
  0x71   :  { %760 = vmatprep.subr.bf16.mxu0 %v1397_v33  ;;  %1239 = vmatpush3.bf16.msra.mxu1 %v1432_v62 }
  0x72   :  { %1240 = vmatprep.subr.bf16.mxu1 %v1433_v63 }
  0x74   :  { %761 = vmatpush2.bf16.msra.mxu0 %v1395_v34 }
  0x75   :  { %762 = vmatprep.subr.bf16.mxu0 %v1400_v35  ;;  %1241 = vmatpush3.bf16.msra.mxu1 %v1434_v0 }
  0x76   :  { %1253 = vmatprep.subr.bf16.mxu1 %v1487_v1 }
  0x78   :  { %763 = vmatpush2.bf16.msra.mxu0 %v1398_v36  ;;  %v1435_v36 = vld [vmem:[%s1632_s5 + $0x18] sm:$0xff]  }
  0x79   :  { %764 = vmatprep.subr.bf16.mxu0 %v1403_v37 }
  0x7c   :  { %765 = vmatpush2.bf16.msra.mxu0 %v1401_v38  ;;  %v1436_v38 = vld [vmem:[%s1632_s5 + $0x10] sm:$0xff]  }
  0x7d   :  { %766 = vmatprep.subr.bf16.mxu0 %v1406_v39  ;;  %v1437_v39 = vld [vmem:[%s1632_s5 + $0x8] sm:$0xff]  }
  0x80   :  { %767 = vmatpush2.bf16.msra.mxu0 %v1404_v40  ;;  %v1438_v40 = vld [vmem:[%s1632_s5] sm:$0xff]   ;;  %s1489_s5 = smov [#allocation5]  }
  0x81   :  { %768 = vmatprep.subr.bf16.mxu0 %v1409_v41  ;;  %s1095_s15 = sshll.u32 %s1489_s5, 4  ;;  %s1096_s15 = int_to_ptr.vmem [resolvable:$true] %s1095_s15 }
  0x82   :  { %p1464_p6 = scmp.lt.s32.totalorder %s1096_s15, %s1096_s15 }
  0x84   :  { %769 = vmatpush2.bf16.msra.mxu0 %v1407_v42  ;;  %v1203_v42 = vld [vmem:[%s1631_s4] ss:$0 sm:$0xff]  ;;  %s1459_s4 = scalar_lea.vmem %s1096_s15, 128 }
  0x85   :  { %770 = vmatprep.subr.bf16.mxu0 %v1412_v43  ;;  %p1460_p5 = scmp.ne.s32.totalorder %s1096_s15, %s1459_s4  ;;  %p1465_p7 = scmp.lt.s32.totalorder %s1459_s4, %s1459_s4 }
  0x87   :  { %p1466_p8 = por %p1465_p7, %p1464_p6 }
  0x88   :  { %771 = vmatpush2.bf16.msra.mxu0 %v1410_v44 }
  0x89   :  { %772 = vmatprep.subr.bf16.mxu0 %v1418_v45  ;;  %p1467_p9 = pnand %p1466_p8, %p1460_p5 }
  0x8c   :  { %773 = vmatpush2.bf16.msra.mxu0 %v1416_v46 }
  0x8f   :  { %775 = vmatmul.mubr.bf16.vlgmr.msra.gmra.mxu0 %v53_v48 }
 0x10f   :  { %v694_v2 = vpop.f32.mrf.mxu0 }
 0x110   :  { %v735_v4 = vpop.f32.mrf.mxu1  ;;  %v695_v21 = vadd.f32 %v694_v2, %v159_v19 }
 0x111   :  { %v696_v3 = vpop.f32.mrf.mxu0 }
 0x112   :  { %v737_v6 = vpop.f32.mrf.mxu1  ;;  %v697_v22 = vadd.f32 %v696_v3, %v163_v20  ;;  %v736_v23 = vadd.f32 %v735_v4, %v695_v21 }
 0x113   :  { %v698_v5 = vpop.f32.mrf.mxu0 }
 0x114   :  { %v739_v8 = vpop.f32.mrf.mxu1  ;;  %v738_v25 = vadd.f32 %v737_v6, %v697_v22 }
 0x115   :  { %v699_v7 = vpop.f32.mrf.mxu0 }
 0x116   :  { %v740_v9 = vpop.f32.mrf.mxu1 }
 0x118   :  { %v817_v10 = vpop.f32.mrf.mxu1 }
 0x11a   :  { %v819_v11 = vpop.f32.mrf.mxu1 }
 0x11c   :  { %v821_v12 = vpop.f32.mrf.mxu1 }
 0x11e   :  { %v822_v13 = vpop.f32.mrf.mxu1 }
 0x14f   :  { %v776_v24 = vpop.f32.mrf.mxu0 }
 0x150   :  { %v777_v26 = vadd.f32 %v776_v24, %v736_v23 }
 0x151   :  { %v778_v27 = vpop.f32.mrf.mxu0 }
 0x152   :  { %v818_v28 = vadd.f32 %v817_v10, %v777_v26  ;;  %v779_v29 = vadd.f32 %v778_v27, %v738_v25 }
 0x153   :  { %v780_v30 = vpop.f32.mrf.mxu0 }
 0x154   :  { %v820_v31 = vadd.f32 %v819_v11, %v779_v29  ;;  %v824_v32 = vmax.f32 %v818_v28, 0.0 }
 0x155   :  { %v781_v33 = vpop.f32.mrf.mxu0 }
 0x156   :  { %v825_v34 = vmax.f32 %v820_v31, 0.0  ;;  %v826_v37 = vpack.c.bf16 %v824_v32, %v824_v32 }
 0x158   :  { %v827_v35 = vpack.c.bf16 %v825_v34, %v825_v34 }
 0x15a   :  { %995 = vmatprep.mubr.bf16.mxu1 %v827_v35 }
 0x15b   :  { %996 = vmatmul.mubr.bf16.vlgmr.msra.gmra.mxu1 %v826_v37 }
 0x15c   :  { %1254 = vmatpush3.bf16.msra.mxu1 %v1435_v36  ;;  %1261 = vmatprep.mubr.msk.bf16.mxu1 %vm1488_vm1, %v1487_v1 }
 0x15d   :  { %1255 = vmatprep.subr.bf16.mxu1 %v1487_v1 }
 0x160   :  { %1256 = vmatpush3.bf16.msra.mxu1 %v1436_v38 }
 0x161   :  { %1257 = vmatprep.subr.bf16.mxu1 %v1487_v1 }
 0x164   :  { %1258 = vmatpush3.bf16.msra.mxu1 %v1437_v39 }
 0x165   :  { %1259 = vmatprep.subr.bf16.mxu1 %v1487_v1 }
 0x168   :  { %1260 = vmatpush3.bf16.msra.mxu1 %v1438_v40 }
 0x21b   :  { %v1242_v41 = vpop.f32.mrf.mxu1 }
 0x21d   :  { %v1243_v43 = vpop.f32.mrf.mxu1 }
 0x21e   :  { %v1244_v44 = vadd.f32 %v1243_v43, %v1242_v41 }
 0x21f   :  { %v1245_v45 = vpop.f32.mrf.mxu1 }
 0x220   :  { %v998_v46 = vadd.f32 %v1244_v44, %v1203_v42 }
 0x221   :  { %v1246_v47 = vpop.f32.mrf.mxu1 }
 0x222   :  { %v1003_v48 = vmax.f32 %v998_v46, 0.0 }
 0x224   :  { %v1004_v49 = vpack.c.bf16 %v1003_v48, %v1003_v48 }
 0x226   :  { %1262 = vmatmul.mubr.msk.bf16.vlgmr.msra.gmra.mxu1 %vm1044_vm2, %v1004_v49 }
 0x2e6   :  { %v1082_v51 = vpop.f32.mrf.mxu1 }
 0x2e7   :  { %v1083_v52 = vadd.f32 %v1220_v50, %v1082_v51 }
 0x2e8   :  { %v1263_v53 = vpop.f32.mrf.mxu1 }
 0x2e9   :  { %1088 = vst [vmem:[#allocation5] sm:$0xff] %v1083_v52 }
 0x2ea   :  { %v1085_v54 = vpop.f32.mrf.mxu1 }
 0x2eb   :  { %1470 = shalt.err (!%p1467_p9)
}
 0x2ec   :  { %1098 = dma.vmem_to_hbm [thread:$0]  %s1096_s15, 128, %s1634_s7, [#allocation4]   ;;  %v1264_v55 = vpop.f32.mrf.mxu1 }
 0x2ed   :  { %1481 = dma.done.wait [#allocation4], 128  }
 0x2ee   :  { %1482 = vsyncadd [#allocation4], 4294967168 }
 0x2ef   :  { %1102 = vsyncpa [#allocation3], 1 }
 0x2f0   :  { %1103 = vsyncpa [#allocation4], 1 }

</bundles_post_ra>
